<compile_context>
chip_gen: v7x
topology: tpu7x:2x2x1
jax: 0.10.0
libtpu: 0.0.40
codegen_flags: <defaults>
</compile_context>

<pallas_src>
import functools

import jax
import jax.numpy as jnp
from jax.experimental import pallas as pl
from jax.experimental.pallas import tpu as pltpu

# grayscale weights used by torchvision.transforms.functional.rgb_to_grayscale
_GRAY_W = (0.2989, 0.587, 0.114)

_LANE = 128
_SUBLANE = 8


def _round_up(x, m):
    return -(-x // m) * m


def _vmem_limit(needed_bytes):
    """Generation-aware scoped-VMEM limit: honest padded budget, clamped to
    3/4 of physical VMEM (v7x: 64 MiB, v5e/v6e: 128 MiB)."""
    try:
        cap = int(pltpu.get_tpu_info().vmem_capacity_bytes)
    except Exception:
        cap = 64 << 20  # smallest current generation (v7x per-TensorCore)
    cap = (cap * 3) // 4
    return int(min(max(int(needed_bytes), 16 << 20), cap))


# -----------------------------------------------------------------------------
# Kernels
# -----------------------------------------------------------------------------
def _fused_aug_kernel(factors_ref, x_ref, o_ref, *, hw):
    # factors_ref: SMEM (2,) f32 -> [contrast, brightness]
    # x_ref/o_ref: VMEM (tb, 3*hw) f32; each row is one image, channels
    #              concatenated along the lane axis.
    c = factors_ref[0]
    b = factors_ref[1]
    x = x_ref[...]

    # Per-image grayscale mean: three lane-range reductions (XLU) + scalar
    # weight combine.  Static slices, lane-aligned when hw % 128 == 0.
    s0 = jnp.sum(x[:, 0 * hw:1 * hw], axis=-1, keepdims=True)
    s1 = jnp.sum(x[:, 1 * hw:2 * hw], axis=-1, keepdims=True)
    s2 = jnp.sum(x[:, 2 * hw:3 * hw], axis=-1, keepdims=True)
    mean = (_GRAY_W[0] * s0 + _GRAY_W[1] * s1 + _GRAY_W[2] * s2) * (1.0 / hw)

    # Fused contrast + brightness + clamps (valid for b > 0):
    #   clip(b*clip(c*x+(1-c)*m,0,1),0,1) == clip(c*b*x + b*(1-c)*m, 0, min(b,1))
    scale = c * b
    off = (b * (1.0 - c)) * mean                     # (tb, 1)
    hi = jnp.minimum(b, 1.0)
    o_ref[...] = jnp.clip(scale * x + off, 0.0, hi)


def _rowsum_kernel(x_ref, o_ref, acc_ref):
    # Per-row sums accumulated across the lane-tile grid axis.
    # x_ref: (rows, lt), o_ref/acc_ref: (rows, 1).  Input is zero-padded along
    # the lane axis in the wrapper, so no masking is needed.
    j = pl.program_id(0)

    @pl.when(j == 0)
    def _():
        acc_ref[...] = jnp.zeros_like(acc_ref)

    acc_ref[...] += jnp.sum(x_ref[...], axis=-1, keepdims=True)

    @pl.when(j == pl.num_programs(0) - 1)
    def _():
        o_ref[...] = acc_ref[...]


def _apply_aug_kernel(factors_ref, mean_ref, x_ref, o_ref):
    # factors_ref: SMEM (2,); mean_ref: VMEM (rows, 1) per-row (per-channel-row)
    # image mean; x_ref/o_ref: VMEM (rows, lt) lane tile.
    c = factors_ref[0]
    b = factors_ref[1]
    hi = jnp.minimum(b, 1.0)
    o_ref[...] = jnp.clip((c * b) * x_ref[...] + (b * (1.0 - c)) * mean_ref[...],
                          0.0, hi)


# -----------------------------------------------------------------------------
# Wrappers
# -----------------------------------------------------------------------------
def _sample_factors(key, contrast_range, intensity_range):
    k1, k2 = jax.random.split(key)
    contrast = jax.random.uniform(
        k1, (), jnp.float32, contrast_range[0], contrast_range[1])
    brightness = jax.random.uniform(
        k2, (), jnp.float32, intensity_range[0], intensity_range[1])
    return jnp.stack([contrast, brightness]).astype(jnp.float32)  # (2,)


def _fused_path(x2, factors, N, C, HW, target):
    """Single pass: whole images per row; one or more images per grid step."""
    itemsize = 4
    img_row_bytes = _round_up(C * HW, _LANE) * itemsize   # padded lane width

    rows_fit = max(1, target // img_row_bytes)
    if rows_fit >= N:
        tb = N
    elif rows_fit >= _SUBLANE:
        tb = (rows_fit // _SUBLANE) * _SUBLANE            # sublane-friendly
    else:
        tb = rows_fit
    grid = (pl.cdiv(N, tb),)                              # ragged last block OK

    padded_tile = _round_up(tb, _SUBLANE) * img_row_bytes
    vmem = _vmem_limit(4 * padded_tile + (2 << 20))       # in+out double-buffered

    return pl.pallas_call(
        functools.partial(_fused_aug_kernel, hw=HW),
        out_shape=jax.ShapeDtypeStruct((N, C * HW), jnp.float32),
        grid=grid,
        in_specs=[
            pl.BlockSpec(memory_space=pltpu.MemorySpace.SMEM),   # factors
            pl.BlockSpec((tb, C * HW), lambda i: (i, 0)),        # image rows
        ],
        out_specs=pl.BlockSpec((tb, C * HW), lambda i: (i, 0)),
        compiler_params=pltpu.CompilerParams(
            dimension_semantics=("parallel",),
            vmem_limit_bytes=vmem),
    )(factors, x2)


def _two_pass_path(x2, factors, N, C, HW, target):
    """Large images: (1) lane-tiled per-row sum reduction, (2) lane-tiled apply
    with per-image means as a tiny VMEM input."""
    itemsize = 4
    rows = N * C                                          # one channel per row
    rows_pad = _round_up(rows, _SUBLANE)

    # Lane tile: multiple of 128, sized so rows_pad * lt * 4 ~ target.
    lt = max(_LANE, (target // (rows_pad * itemsize)) // _LANE * _LANE)
    lt = min(lt, _round_up(HW, _LANE))
    hw_p = _round_up(HW, lt)
    if hw_p != HW:                                        # rare: zero-pad lanes
        x2 = jnp.pad(x2, ((0, 0), (0, hw_p - HW)))
    grid = (hw_p // lt,)
    tile_bytes = rows_pad * lt * itemsize

    # Pass 1: per-row sums (zero padding does not change the sum).
    sums = pl.pallas_call(
        _rowsum_kernel,
        out_shape=jax.ShapeDtypeStruct((rows, 1), jnp.float32),
        grid=grid,
        in_specs=[pl.BlockSpec((rows, lt), lambda j: (0, j))],
        out_specs=pl.BlockSpec((rows, 1), lambda j: (0, 0)),
        scratch_shapes=[pltpu.VMEM((rows, 1), jnp.float32)],
        compiler_params=pltpu.CompilerParams(
            dimension_semantics=("arbitrary",),
            vmem_limit_bytes=_vmem_limit(2 * tile_bytes + (2 << 20))),
    )(x2)

    # Combine channel sums with grayscale weights (tiny (N,3)->(N,) op).
    w = jnp.asarray(_GRAY_W, jnp.float32)
    img_mean = (sums.reshape(N, C) @ w) * (1.0 / HW)      # (N,)
    row_mean = jnp.repeat(img_mean, C).reshape(rows, 1)   # (N*C, 1)

    # Pass 2: apply fused contrast + brightness, streaming lane tiles.
    out = pl.pallas_call(
        _apply_aug_kernel,
        out_shape=jax.ShapeDtypeStruct((rows, hw_p), jnp.float32),
        grid=grid,
        in_specs=[
            pl.BlockSpec(memory_space=pltpu.MemorySpace.SMEM),   # factors
            pl.BlockSpec((rows, 1), lambda j: (0, 0)),           # per-row means
            pl.BlockSpec((rows, lt), lambda j: (0, j)),          # x tile
        ],
        out_specs=pl.BlockSpec((rows, lt), lambda j: (0, j)),
        compiler_params=pltpu.CompilerParams(
            dimension_semantics=("parallel",),
            vmem_limit_bytes=_vmem_limit(4 * tile_bytes + (2 << 20))),
    )(factors, row_mean, x2)

    if hw_p != HW:
        out = out[:, :HW]
    return out


def custom_augmentation(x, key,
                        contrast_range=(0.2, 1.5),
                        intensity_range=(0.2, 2.0),
                        target_tile_bytes=8 << 20):
    """x: float array of shape (N, 3, H, W) with values in [0, 1]."""
    N, C, H, W = x.shape
    assert C == 3, "rgb_to_grayscale path assumes 3 channels"
    # The fused clamp identity requires a strictly positive brightness factor.
    assert intensity_range[0] > 0, "intensity_range must be > 0"
    HW = H * W

    x = x.astype(jnp.float32)
    factors = _sample_factors(key, contrast_range, intensity_range)

    img_row_bytes = _round_up(C * HW, _LANE) * 4
    if img_row_bytes <= target_tile_bytes:
        # Single pass: whole images per row (lane-dense, no channel padding).
        out = _fused_path(x.reshape(N, C * HW), factors, N, C, HW,
                          target_tile_bytes)
    else:
        # Image too large for one tile: two-pass (mean reduce, then apply).
        out = _two_pass_path(x.reshape(N * C, HW), factors, N, C, HW,
                             target_tile_bytes)
    return out.reshape(N, C, H, W)


# -----------------------------------------------------------------------------
# Reference + self-check
# -----------------------------------------------------------------------------
def _reference(x, factors):
    c, b = factors[0], factors[1]
    gray = (_GRAY_W[0] * x[:, 0] + _GRAY_W[1] * x[:, 1]
            + _GRAY_W[2] * x[:, 2])                       # (N, H, W)
    mean = gray.mean(axis=(-2, -1))[:, None, None, None]  # (N, 1, 1, 1)
    y = jnp.clip(c * x + (1.0 - c) * mean, 0.0, 1.0)
    return jnp.clip(b * y, 0.0, 1.0)


if __name__ == "__main__":
    key = jax.random.PRNGKey(0)
    kx, kf = jax.random.split(key)

    N, C, H, W = 2, 3, 16, 16
    x = jax.random.uniform(kx, (N, C, H, W), jnp.float32)   # values in [0, 1]

    # Single-pass (fused) path.
    out = custom_augmentation(x, kf)
    out = jax.block_until_ready(out)

    factors = _sample_factors(kf, (0.2, 1.5), (0.2, 2.0))
    ref = _reference(x, factors)
    assert out.shape == ref.shape
    assert jnp.allclose(out, ref, atol=1e-5, rtol=1e-5), "fused path mismatch"

    # Exercise the two-pass (large-image) path by shrinking the tile budget so
    # a single image no longer "fits" a tile.
    out2 = custom_augmentation(x, kf, target_tile_bytes=2048)
    out2 = jax.block_until_ready(out2)
    assert jnp.allclose(out2, ref, atol=1e-5, rtol=1e-5), "two-pass mismatch"

    print("KERNEL_OK")
</pallas_src>

<mosaic_0001>
module attributes {stable_mosaic.version = 11 : i64} {
  func.func @_fused_aug_kernel(%arg0: i32, %arg1: memref<2xf32, #tpu.memory_space<smem>>, %arg2: memref<2x768xf32, #tpu.memory_space<vmem>>, %arg3: memref<2x768xf32, #tpu.memory_space<vmem>>) attributes {dimension_semantics = [#tpu.dimension_semantics<parallel>], iteration_bounds = array<i64: 1>, scalar_prefetch = 0 : i64, scratch_operands = 0 : i64, tpu.core_type = #tpu.core_type<tc>, window_params = [{transform_indices = @transform_0, window_bounds = array<i64: 2>}, {transform_indices = @transform_1, window_bounds = array<i64: 2, 768>}, {transform_indices = @transform_2, window_bounds = array<i64: 2, 768>}]} {
    %c0 = arith.constant 0 : index
    %0 = memref.load %arg1[%c0] : memref<2xf32, #tpu.memory_space<smem>>
    %c1 = arith.constant 1 : index
    %1 = memref.load %arg1[%c1] : memref<2xf32, #tpu.memory_space<smem>>
    %c0_0 = arith.constant 0 : index
    %c0_1 = arith.constant 0 : index
    %2 = vector.load %arg2[%c0_0, %c0_1] : memref<2x768xf32, #tpu.memory_space<vmem>>, vector<2x768xf32>
    %3 = vector.extract_strided_slice %2 {offsets = [0, 0], sizes = [2, 256], strides = [1, 1]} : vector<2x768xf32> to vector<2x256xf32>
    %cst = arith.constant dense<0.000000e+00> : vector<2xf32>
    %4 = vector.multi_reduction <add>, %3, %cst [1] : vector<2x256xf32> to vector<2xf32>
    %5 = vector.shape_cast %4 : vector<2xf32> to vector<2x1xf32>
    %6 = vector.extract_strided_slice %2 {offsets = [0, 256], sizes = [2, 256], strides = [1, 1]} : vector<2x768xf32> to vector<2x256xf32>
    %cst_2 = arith.constant dense<0.000000e+00> : vector<2xf32>
    %7 = vector.multi_reduction <add>, %6, %cst_2 [1] : vector<2x256xf32> to vector<2xf32>
    %8 = vector.shape_cast %7 : vector<2xf32> to vector<2x1xf32>
    %9 = vector.extract_strided_slice %2 {offsets = [0, 512], sizes = [2, 256], strides = [1, 1]} : vector<2x768xf32> to vector<2x256xf32>
    %cst_3 = arith.constant dense<0.000000e+00> : vector<2xf32>
    %10 = vector.multi_reduction <add>, %9, %cst_3 [1] : vector<2x256xf32> to vector<2xf32>
    %11 = vector.shape_cast %10 : vector<2xf32> to vector<2x1xf32>
    %cst_4 = arith.constant 2.989000e-01 : f32
    %12 = vector.broadcast %cst_4 : f32 to vector<2x1xf32>
    %13 = arith.mulf %12, %5 : vector<2x1xf32>
    %cst_5 = arith.constant 5.870000e-01 : f32
    %14 = vector.broadcast %cst_5 : f32 to vector<2x1xf32>
    %15 = arith.mulf %14, %8 : vector<2x1xf32>
    %16 = arith.addf %13, %15 : vector<2x1xf32>
    %cst_6 = arith.constant 1.140000e-01 : f32
    %17 = vector.broadcast %cst_6 : f32 to vector<2x1xf32>
    %18 = arith.mulf %17, %11 : vector<2x1xf32>
    %19 = arith.addf %16, %18 : vector<2x1xf32>
    %cst_7 = arith.constant 3.906250e-03 : f32
    %20 = vector.broadcast %cst_7 : f32 to vector<2x1xf32>
    %21 = arith.mulf %19, %20 : vector<2x1xf32>
    %22 = arith.mulf %0, %1 : f32
    %cst_8 = arith.constant 1.000000e+00 : f32
    %23 = arith.subf %cst_8, %0 : f32
    %24 = arith.mulf %1, %23 : f32
    %25 = vector.broadcast %24 : f32 to vector<2x1xf32>
    %26 = arith.mulf %25, %21 : vector<2x1xf32>
    %cst_9 = arith.constant 1.000000e+00 : f32
    %27 = arith.minimumf %1, %cst_9 : f32
    %28 = vector.broadcast %22 : f32 to vector<2x768xf32>
    %29 = arith.mulf %28, %2 : vector<2x768xf32>
    %30 = vector.broadcast %26 : vector<2x1xf32> to vector<2x768xf32>
    %31 = arith.addf %29, %30 : vector<2x768xf32>
    %cst_10 = arith.constant 0.000000e+00 : f32
    %32 = vector.broadcast %cst_10 : f32 to vector<2x768xf32>
    %33 = arith.maximumf %32, %31 : vector<2x768xf32>
    %34 = vector.broadcast %27 : f32 to vector<2x768xf32>
    %35 = arith.minimumf %34, %33 : vector<2x768xf32>
    %c0_11 = arith.constant 0 : index
    %c0_12 = arith.constant 0 : index
    %36 = vector.load %arg3[%c0_11, %c0_12] : memref<2x768xf32, #tpu.memory_space<vmem>>, vector<2x768xf32>
    tpu.vector_store %arg3[%c0_11, %c0_12], %35 {strides = array<i32>} : memref<2x768xf32, #tpu.memory_space<vmem>>, vector<2x768xf32>,
    return
  }
  func.func @transform_0(%arg0: i32) -> i32 {
    %c0_i32 = arith.constant 0 : i32
    %c0_i32_0 = arith.constant 0 : i32
    return %c0_i32 : i32
  }
  func.func @transform_1(%arg0: i32) -> (i32, i32) {
    %c0_i32 = arith.constant 0 : i32
    %c0_i32_0 = arith.constant 0 : i32
    return %arg0, %c0_i32 : i32, i32
  }
  func.func @transform_2(%arg0: i32) -> (i32, i32) {
    %c0_i32 = arith.constant 0 : i32
    %c0_i32_0 = arith.constant 0 : i32
    return %arg0, %c0_i32 : i32, i32
  }
}

</mosaic_0001>

<bundles_post_ra>
// kernel: tpu_custom_call.1
= control target key start
LH: loop header
LB: loop body
LE: loop exit
PB: predicated region body
PF: predicated region fallthrough
CT: control target
= control target key end

     0   :  { %7 = vsyncpa [#allocation5], 0  ;;  %s262_s0 = inlined_call_operand.hbm [shape: f32[2], index: 0, kind: input, shape index: {}]   ;;  %s263_s1 = inlined_call_operand.hbm [shape: f32[2,768], index: 1, kind: input, shape index: {}]   ;;  %s264_s2 = inlined_call_operand.hbm [shape: f32[2,768], index: 2, kind: output, shape index: {}]  }
   0x1   :  { %8 = vsyncpa [#allocation3], 0 }
   0x2   :  { %9 = vsyncpa [#allocation4], 0  ;;  %s145_s11 = scalar_lea.hbm %s262_s0, 16 }
   0x3   :  { %p146_p0 = scmp.ne.s32.totalorder %s262_s0, %s145_s11  ;;  %p149_p1 = scmp.lt.u32.totalorder %s145_s11, %s262_s0 }
   0x5   :  { %p151_p2 = pnand %p149_p1, %p146_p0 }
   0x7   :  { %154 = shalt.err (!%p151_p2)
}
   0x8   :  { %s205_s16 = smov [#allocation2]   ;;  %s206_s19 = smov [#allocation6]  }
   0x9   :  { %17 = dma.hbm_to_smem %s262_s0, 16, %s205_s16, [#allocation5]  }
   0xa   :  { %s24_s20 = sshll.u32 %s206_s19, 4  ;;  %s155_s23 = scalar_lea.hbm %s263_s1, 192  ;;  %s25_s20 = int_to_ptr.vmem [resolvable:$true] %s24_s20 }
   0xb   :  { %p156_p3 = scmp.ne.s32.totalorder %s263_s1, %s155_s23  ;;  %p159_p4 = scmp.lt.u32.totalorder %s155_s23, %s263_s1 }
   0xd   :  { %p161_p5 = pnand %p159_p4, %p156_p3 }
   0xf   :  { %164 = shalt.err (!%p161_p5)
}
  0x10   :  { %s165_s28 = scalar_lea.vmem %s25_s20, 192  ;;  %p170_p7 = scmp.lt.s32.totalorder %s25_s20, %s25_s20 }
  0x11   :  { %p166_p6 = scmp.ne.s32.totalorder %s25_s20, %s165_s28  ;;  %p171_p8 = scmp.lt.s32.totalorder %s165_s28, %s165_s28 }
  0x13   :  { %p172_p9 = por %p171_p8, %p170_p7 }
  0x15   :  { %p173_p10 = pnand %p172_p9, %p166_p6 }
  0x17   :  { %176 = shalt.err (!%p173_p10)
}
  0x18   :  { %27 = dma.hbm_to_vmem [thread:$0]  %s263_s1, 192, %s25_s20, [#allocation3]  }
  0x19   :  { %199 = dma.done.wait [#allocation5], 16  }
  0x1a   :  { %200 = vsyncadd [#allocation5], 4294967280 }
  0x1b   :  { %201 = dma.done.wait [#allocation3], 192  }
  0x1c   :  { %202 = vsyncadd [#allocation3], 4294967104 }
  0x1d   :  { %34 = sfence }
  0x1e   :  { %v43_v0 = vlaneseq  ;;  %v207_v1 = vmov 1983009808   ;;  %v37_v3 = vld [vmem:[#allocation6] sm:$0xff]  ;;  %v38_v7 = vld [vmem:[#allocation6 + $0x8] sm:$0xf]  ;;  %vm50_vm0 = vcmask 1041408  }
  0x1f   :  { %v41_v2 = vunpack.c.l.s4 %v207_v1  ;;  %v56_v6 = vcombine.high %v37_v3, %v37_v3  ;;  %s35_s1 = sld [smem:[#allocation2]]  ;;  %s137_s30 = sld [smem:[#allocation2 + $0x1]]  ;;  %v208_v26 = vmov 269488144  }
  0x20   :  { %v44_v4 = vshrl.u32 %v43_v0, 7  ;;  %v105_v27 = vunpack.c.l.s4 %v208_v26  ;;  %s209_s6 = smov 1.0   ;;  %s210_s8 = smov [#allocation7]  }
  0x21   :  { %v42_v5 = vunpack.c.0.s8 %v41_v2  ;;  %s127_s9 = sshll.u32 %s210_s8, 4  ;;  %s128_s9 = int_to_ptr.vmem [resolvable:$true] %s127_s9 }
  0x22   :  { %v106_v33 = vunpack.c.0.s8 %v105_v27  ;;  %s177_s10 = scalar_lea.vmem %s128_s9, 192  ;;  %p182_p12 = scmp.lt.s32.totalorder %s128_s9, %s128_s9 }
  0x23   :  { %v45_v8 = vsub.s32 %v42_v5, %v44_v4  ;;  %p178_p11 = scmp.ne.s32.totalorder %s128_s9, %s177_s10  ;;  %p183_p13 = scmp.lt.s32.totalorder %s177_s10, %s177_s10 }
  0x24   :  { %v109_v37 = vsub.s32 %v106_v33, %v44_v4 }
  0x25   :  { %v46_v9 = vrot.slane %v37_v3, %v45_v8  ;;  %v63_v10 = vrot.slane %v56_v6, %v45_v8  ;;  %v79_v11 = vrot.slane %v38_v7, %v45_v8  ;;  %s95_s3 = ssub.f32 1.0, %s35_s1  ;;  %s94_s4 = smul.f32 %s137_s30, %s35_s1 }
  0x26   :  { %s99_s7 = smin.f32 %s209_s6, %s137_s30  ;;  %p184_p0 = por %p183_p13, %p182_p12 }
  0x27   :  { %v47_v12 = vcombine.high %v46_v9, %v46_v9  ;;  %v51_v13 = vsel %vm50_vm0, %v46_v9, 0.0  ;;  %v64_v14 = vcombine.high %v63_v10, %v63_v10  ;;  %v80_v15 = vcombine.high %v79_v11, %v79_v11  ;;  %s96_s5 = smul.f32 %s137_s30, %s95_s3 }
  0x28   :  { %v83_v16 = vsel %vm50_vm0, %v79_v11, 0.0  ;;  %v67_v18 = vsel %vm50_vm0, %v63_v10, 0.0  ;;  %v100_v35 = vstv %s94_s4  ;;  %v116_v45 = vstv %s99_s7  ;;  %p185_p1 = pnand %p184_p0, %p178_p11 }
  0x29   :  { %v52_v17 = vsel %vm50_vm0, %v47_v12, 0.0  ;;  %v68_v19 = vsel %vm50_vm0, %v64_v14, 0.0  ;;  %v84_v21 = vsel %vm50_vm0, %v80_v15, 0.0  ;;  %v97_v36 = vstv %s96_s5 }
  0x2a   :  { %v53_v20 = vadd.f32 %v52_v17, %v51_v13  ;;  %v85_v22 = vadd.f32 %v84_v21, %v83_v16  ;;  %v69_v23 = vadd.f32 %v68_v19, %v67_v18  ;;  %v102_v39 = vmul.f32 %v100_v35, %v38_v7 }
  0x2b   :  { %v101_v41 = vmul.f32 %v100_v35, %v37_v3 }
  0x2c   :  { %54 = vadd.xlane.f32.xlu0 %v53_v20  ;;  %86 = vadd.xlane.f32.xlu1 %v85_v22 }
  0x30   :  { %70 = vadd.xlane.f32.xlu0 %v69_v23 }
  0xb9   :  { %v55_v24 = vpop.xlane.xlu0 %54  ;;  %v87_v25 = vpop.xlane.xlu1 %86 }
  0xba   :  { %v88_v29 = vmul.f32 0.2989, %v55_v24  ;;  %v91_v31 = vmul.f32 0.114, %v87_v25 }
  0xbd   :  { %v71_v28 = vpop.xlane.xlu0 %70 }
  0xbe   :  { %v89_v30 = vmul.f32 0.587, %v71_v28 }
  0xc0   :  { %v90_v32 = vadd.f32 %v89_v30, %v88_v29 }
  0xc2   :  { %v92_v34 = vadd.f32 %v91_v31, %v90_v32 }
  0xc4   :  { %v93_v38 = vmul.f32 0.00390625, %v92_v34 }
  0xc6   :  { %v98_v40 = vmul.f32 %v97_v36, %v93_v38 }
  0xc8   :  { %v110_v42 = vrot.slane %v98_v40, %v109_v37 }
  0xca   :  { %v112_v43 = vadd.f32 %v110_v42, %v101_v41  ;;  %v113_v44 = vadd.f32 %v110_v42, %v102_v39 }
  0xcc   :  { %v114_v46 = vmax.f32 %v112_v43, 0.0  ;;  %v115_v47 = vmax.f32 %v113_v44, 0.0 }
  0xce   :  { %v117_v48 = vmin.f32 %v116_v45, %v114_v46  ;;  %v118_v49 = vmin.f32 %v116_v45, %v115_v47 }
  0xd0   :  { %119 = vst [vmem:[#allocation7] sm:$0xff] %v117_v48  ;;  %120 = vst [vmem:[#allocation7 + $0x8] sm:$0xf] %v118_v49 }
  0xd1   :  { %188 = shalt.err (!%p185_p1)
}
  0xd2   :  { %s189_s13 = scalar_lea.hbm %s264_s2, 192 }
  0xd3   :  { %p190_p2 = scmp.ne.s32.totalorder %s264_s2, %s189_s13  ;;  %p193_p3 = scmp.lt.u32.totalorder %s189_s13, %s264_s2 }
  0xd5   :  { %p195_p4 = pnand %p193_p3, %p190_p2 }
  0xd7   :  { %198 = shalt.err (!%p195_p4)
}
  0xd8   :  { %130 = dma.vmem_to_hbm [thread:$0]  %s128_s9, 192, %s264_s2, [#allocation4]  }
  0xd9   :  { %203 = dma.done.wait [#allocation4], 192  }
  0xda   :  { %204 = vsyncadd [#allocation4], 4294967104 }
  0xdb   :  { %134 = vsyncpa [#allocation3], 1 }
  0xdc   :  { %135 = vsyncpa [#allocation4], 1 }
  0xdd   :  { %136 = vsyncpa [#allocation5], 1 }

</bundles_post_ra>
